<compile_context>
chip_gen: v7x
topology: tpu7x:2x2x1
jax: 0.10.0
libtpu: 0.0.40
codegen_flags: <defaults>
</compile_context>

<pallas_src>
import math
from functools import partial

import jax
import jax.numpy as jnp
from jax import lax
from jax.experimental import pallas as pl
from jax.experimental.pallas import tpu as pltpu

_SUBLANES = 8                 # f32 sublane rows of a vreg; minimum token group
_GATHER_INFLIGHT = 8          # rows per in-flight DMA group (HBM-gather path)
_MAX_SMEM_TOKENS = 64 * 1024  # per-call cap on scalar-prefetched ids (<=256 KiB SMEM)


def _round_up(x, m):
    return ((x + m - 1) // m) * m


def _vmem_capacity_bytes():
    """Physical VMEM per TensorCore; conservative 64 MiB (v7x) if unavailable."""
    try:
        return int(pltpu.get_tpu_info().vmem_capacity_bytes)
    except Exception:
        return 64 * 1024 * 1024


def _choose_block_tokens(n_tokens, desired):
    """Largest multiple of 8 that divides n_tokens (a multiple of 8) and is <= desired."""
    t = min(desired, n_tokens)
    t -= t % _SUBLANES
    t = max(t, _SUBLANES)
    while n_tokens % t != 0:
        t -= _SUBLANES
    return t


# ----------------------------------------------------------------------------
# Kernel A: table resident in VMEM, in-kernel gather with dense 8-row stores.
# ----------------------------------------------------------------------------
def _embed_vmem_kernel(ids_smem, table_ref, out_ref, *, block_tokens, scale):
    base = pl.program_id(0) * block_tokens
    scale_f = jnp.float32(scale)
    n_groups = block_tokens // _SUBLANES

    def group_body(g, carry):
        off = pl.multiple_of(g * _SUBLANES, _SUBLANES)
        rows = [table_ref[pl.ds(ids_smem[base + off + r], 1), :]
                for r in range(_SUBLANES)]
        slab = jnp.concatenate(rows, axis=0)                    # (8, d_model)
        out_ref[pl.ds(off, _SUBLANES), :] = (slab * scale_f).astype(out_ref.dtype)
        return carry

    lax.fori_loop(0, n_groups, group_body, 0, unroll=min(n_groups, 4))


# ----------------------------------------------------------------------------
# Kernel B: table stays in HBM, manual row-gather DMAs into the output tile.
# Used when the table does not fit in VMEM (realistic vocabularies, v7x 64 MiB).
# ----------------------------------------------------------------------------
def _embed_hbm_kernel(ids_smem, table_hbm, out_ref, copy_sems, *, block_tokens, scale):
    base = pl.program_id(0) * block_tokens
    scale_f = jnp.float32(scale)
    n_groups = block_tokens // _GATHER_INFLIGHT

    def issue(g, slot):
        off = g * _GATHER_INFLIGHT
        for r in range(_GATHER_INFLIGHT):
            tok = ids_smem[base + off + r]
            pltpu.make_async_copy(table_hbm.at[tok], out_ref.at[off + r],
                                  copy_sems.at[slot, r]).start()

    def wait(g, slot):
        off = g * _GATHER_INFLIGHT
        for r in range(_GATHER_INFLIGHT):
            pltpu.make_async_copy(table_hbm.at[0], out_ref.at[off + r],
                                  copy_sems.at[slot, r]).wait()

    issue(0, 0)

    def body(g, carry):
        slot = g & 1

        @pl.when(g + 1 < n_groups)
        def _():
            issue(g + 1, 1 - slot)      # keep next row group in flight

        wait(g, slot)
        return carry

    lax.fori_loop(0, n_groups, body, 0)
    # One dense VPU pass for the sqrt(d_model) scale over the gathered tile.
    out_ref[...] = (out_ref[...] * scale_f).astype(out_ref.dtype)


# ----------------------------------------------------------------------------
# One pallas_call over a slab of tokens (slab length is a multiple of the tile).
# ----------------------------------------------------------------------------
def _embed_tokens(ids_slab, table, *, block_tokens, resident, single_buffer,
                  vmem_limit, scale):
    n_tok = int(ids_slab.shape[0])
    vocab, d_model = table.shape
    num_chunks = n_tok // block_tokens
    out_spec = pl.BlockSpec((block_tokens, d_model), lambda i, ids: (i, 0))

    if resident:
        kernel = partial(_embed_vmem_kernel, block_tokens=block_tokens, scale=scale)
        table_map = lambda i, ids: (0, 0)          # constant -> DMA'd from HBM once
        if single_buffer and hasattr(pl, "Buffered"):
            try:   # keep a single VMEM copy of the resident table
                table_spec = pl.BlockSpec((vocab, d_model), table_map,
                                          pipeline_mode=pl.Buffered(1))
            except TypeError:
                table_spec = pl.BlockSpec((vocab, d_model), table_map)
        else:
            table_spec = pl.BlockSpec((vocab, d_model), table_map)
        scratch = []
    else:
        kernel = partial(_embed_hbm_kernel, block_tokens=block_tokens, scale=scale)
        table_spec = pl.BlockSpec(memory_space=pl.ANY)   # raw HBM ref, manual DMA gather
        scratch = [pltpu.SemaphoreType.DMA((2, _GATHER_INFLIGHT))]

    return pl.pallas_call(
        kernel,
        out_shape=jax.ShapeDtypeStruct((n_tok, d_model), table.dtype),
        grid_spec=pltpu.PrefetchScalarGridSpec(
            num_scalar_prefetch=1,                 # ids slab -> SMEM
            grid=(num_chunks,),
            in_specs=[table_spec],
            out_specs=out_spec,
            scratch_shapes=scratch,
        ),
        compiler_params=pltpu.CompilerParams(
            dimension_semantics=("parallel",),     # independent tiles -> megacore on v7x
            vmem_limit_bytes=vmem_limit,
        ),
    )(ids_slab, table)


# ----------------------------------------------------------------------------
# Wrapper: ids (B, S) int32, table (vocab, d_model) -> table[ids] * sqrt(d_model)
# ----------------------------------------------------------------------------
def embeddings_forward(ids, table, *, tokens_per_step=512):
    B, S = ids.shape
    vocab, d_model = table.shape
    N = B * S
    scale = float(math.sqrt(d_model))

    itemsize = jnp.dtype(table.dtype).itemsize
    row_bytes = d_model * itemsize
    table_bytes = vocab * d_model * itemsize

    budget = max(_vmem_capacity_bytes() - (8 << 20), 16 << 20)  # physical VMEM - headroom
    margin = 2 << 20
    min_tiles = 2 * _SUBLANES * row_bytes                       # smallest double-buffered tile

    if 2 * table_bytes + min_tiles + margin <= budget:
        resident, single_buffer, table_vmem = True, False, 2 * table_bytes
    elif hasattr(pl, "Buffered") and table_bytes + min_tiles + margin <= budget:
        resident, single_buffer, table_vmem = True, True, table_bytes
    else:
        resident, single_buffer, table_vmem = False, False, 0   # HBM row-gather path

    # Largest tile (tokens) whose double-buffered output fits next to the table.
    t_max = (budget - table_vmem - margin) // (2 * row_bytes)
    t_max = max(_SUBLANES, (t_max // _SUBLANES) * _SUBLANES)
    t_desired = max(_SUBLANES, (min(tokens_per_step, t_max) // _SUBLANES) * _SUBLANES)

    flat_ids = ids.reshape(N).astype(jnp.int32)
    n_pad = _round_up(N, _SUBLANES)                 # pad only to a multiple of 8
    if n_pad != N:
        flat_ids = jnp.pad(flat_ids, (0, n_pad - N))   # row 0 is always a valid row

    # Split very large B*S into slabs so per-call scalar-prefetched ids stay in SMEM.
    # TODO(synk): replace slabbing with per-chunk (1, T) blocked SMEM ids specs.
    slab_cap = max(t_desired, (_MAX_SMEM_TOKENS // t_desired) * t_desired)

    outs = []
    start = 0
    while start < n_pad:
        slab_len = min(slab_cap, n_pad - start)
        block_tokens = _choose_block_tokens(slab_len, t_desired)
        # Keep both v7x TensorCores busy when the whole problem is one tile.
        if slab_len // block_tokens == 1 and block_tokens % (2 * _SUBLANES) == 0:
            block_tokens //= 2
        vmem_limit = int(min(budget, max(32 << 20,
                                         table_vmem + 2 * block_tokens * row_bytes + margin)))
        outs.append(_embed_tokens(
            flat_ids[start:start + slab_len], table,
            block_tokens=block_tokens, resident=resident, single_buffer=single_buffer,
            vmem_limit=vmem_limit, scale=scale))
        start += slab_len

    out = outs[0] if len(outs) == 1 else jnp.concatenate(outs, axis=0)
    if n_pad != N:
        out = out[:N]                                # only for ragged N (N % 8 != 0)
    return out.reshape(B, S, d_model)


if __name__ == "__main__":
    # Small, deterministic setup consistent with Embeddings(d_model, vocab).
    d_model = 128
    vocab = 64
    B, S = 2, 8

    key = jax.random.PRNGKey(0)
    k_tab, k_ids = jax.random.split(key)

    # nn.Embedding default init: weights ~ N(0, 1)
    table = jax.random.normal(k_tab, (vocab, d_model), dtype=jnp.float32)
    ids = jax.random.randint(k_ids, (B, S), 0, vocab, dtype=jnp.int32)

    out = embeddings_forward(ids, table)
    out = jax.block_until_ready(out)

    # Reference: plain-JAX embedding lookup * sqrt(d_model)
    ref = table[ids] * jnp.float32(math.sqrt(d_model))
    assert out.shape == (B, S, d_model)
    assert jnp.allclose(out, ref, atol=1e-5, rtol=1e-5)

    print("KERNEL_OK")
</pallas_src>

<mosaic_0001>
module attributes {stable_mosaic.version = 11 : i64} {
  func.func @_embed_vmem_kernel(%arg0: i32, %arg1: memref<16xi32, #tpu.memory_space<smem>>, %arg2: memref<64x128xf32, #tpu.memory_space<vmem>>, %arg3: memref<8x128xf32, #tpu.memory_space<vmem>>) attributes {dimension_semantics = [#tpu.dimension_semantics<parallel>], iteration_bounds = array<i64: 2>, scalar_prefetch = 1 : i64, scratch_operands = 0 : i64, tpu.core_type = #tpu.core_type<tc>, window_params = [{pipeline_mode = #tpu.pipeline_mode<synchronous>, transform_indices = @transform_0, window_bounds = array<i64: 64, 128>}, {transform_indices = @transform_1, window_bounds = array<i64: 8, 128>}]} {
    %c8_i32 = arith.constant 8 : i32
    %0 = arith.muli %arg0, %c8_i32 : i32
    %cst = arith.constant 11.3137083 : f32
    %c0_i32 = arith.constant 0 : i32
    %c8_i32_0 = arith.constant 8 : i32
    %1 = arith.muli %c0_i32, %c8_i32_0 : i32
    %2 = tpu.assume_multiple %1, 8 : i32
    %3 = arith.addi %0, %2 : i32
    %c0_i32_1 = arith.constant 0 : i32
    %4 = arith.addi %3, %c0_i32_1 : i32
    %5 = arith.index_cast %4 : i32 to index
    %6 = memref.load %arg1[%5] : memref<16xi32, #tpu.memory_space<smem>>
    %7 = arith.index_cast %6 : i32 to index
    %c0 = arith.constant 0 : index
    %8 = vector.load %arg2[%7, %c0] : memref<64x128xf32, #tpu.memory_space<vmem>>, vector<1x128xf32>
    %9 = arith.addi %0, %2 : i32
    %c1_i32 = arith.constant 1 : i32
    %10 = arith.addi %9, %c1_i32 : i32
    %11 = arith.index_cast %10 : i32 to index
    %12 = memref.load %arg1[%11] : memref<16xi32, #tpu.memory_space<smem>>
    %13 = arith.index_cast %12 : i32 to index
    %c0_2 = arith.constant 0 : index
    %14 = vector.load %arg2[%13, %c0_2] : memref<64x128xf32, #tpu.memory_space<vmem>>, vector<1x128xf32>
    %15 = arith.addi %0, %2 : i32
    %c2_i32 = arith.constant 2 : i32
    %16 = arith.addi %15, %c2_i32 : i32
    %17 = arith.index_cast %16 : i32 to index
    %18 = memref.load %arg1[%17] : memref<16xi32, #tpu.memory_space<smem>>
    %19 = arith.index_cast %18 : i32 to index
    %c0_3 = arith.constant 0 : index
    %20 = vector.load %arg2[%19, %c0_3] : memref<64x128xf32, #tpu.memory_space<vmem>>, vector<1x128xf32>
    %21 = arith.addi %0, %2 : i32
    %c3_i32 = arith.constant 3 : i32
    %22 = arith.addi %21, %c3_i32 : i32
    %23 = arith.index_cast %22 : i32 to index
    %24 = memref.load %arg1[%23] : memref<16xi32, #tpu.memory_space<smem>>
    %25 = arith.index_cast %24 : i32 to index
    %c0_4 = arith.constant 0 : index
    %26 = vector.load %arg2[%25, %c0_4] : memref<64x128xf32, #tpu.memory_space<vmem>>, vector<1x128xf32>
    %27 = arith.addi %0, %2 : i32
    %c4_i32 = arith.constant 4 : i32
    %28 = arith.addi %27, %c4_i32 : i32
    %29 = arith.index_cast %28 : i32 to index
    %30 = memref.load %arg1[%29] : memref<16xi32, #tpu.memory_space<smem>>
    %31 = arith.index_cast %30 : i32 to index
    %c0_5 = arith.constant 0 : index
    %32 = vector.load %arg2[%31, %c0_5] : memref<64x128xf32, #tpu.memory_space<vmem>>, vector<1x128xf32>
    %33 = arith.addi %0, %2 : i32
    %c5_i32 = arith.constant 5 : i32
    %34 = arith.addi %33, %c5_i32 : i32
    %35 = arith.index_cast %34 : i32 to index
    %36 = memref.load %arg1[%35] : memref<16xi32, #tpu.memory_space<smem>>
    %37 = arith.index_cast %36 : i32 to index
    %c0_6 = arith.constant 0 : index
    %38 = vector.load %arg2[%37, %c0_6] : memref<64x128xf32, #tpu.memory_space<vmem>>, vector<1x128xf32>
    %39 = arith.addi %0, %2 : i32
    %c6_i32 = arith.constant 6 : i32
    %40 = arith.addi %39, %c6_i32 : i32
    %41 = arith.index_cast %40 : i32 to index
    %42 = memref.load %arg1[%41] : memref<16xi32, #tpu.memory_space<smem>>
    %43 = arith.index_cast %42 : i32 to index
    %c0_7 = arith.constant 0 : index
    %44 = vector.load %arg2[%43, %c0_7] : memref<64x128xf32, #tpu.memory_space<vmem>>, vector<1x128xf32>
    %45 = arith.addi %0, %2 : i32
    %c7_i32 = arith.constant 7 : i32
    %46 = arith.addi %45, %c7_i32 : i32
    %47 = arith.index_cast %46 : i32 to index
    %48 = memref.load %arg1[%47] : memref<16xi32, #tpu.memory_space<smem>>
    %49 = arith.index_cast %48 : i32 to index
    %c0_8 = arith.constant 0 : index
    %50 = vector.load %arg2[%49, %c0_8] : memref<64x128xf32, #tpu.memory_space<vmem>>, vector<1x128xf32>
    %51 = tpu.concatenate %8, %14, %20, %26, %32, %38, %44, %50 in 0 : vector<1x128xf32>, vector<1x128xf32>, vector<1x128xf32>, vector<1x128xf32>, vector<1x128xf32>, vector<1x128xf32>, vector<1x128xf32>, vector<1x128xf32> -> vector<8x128xf32>
    %52 = vector.broadcast %cst : f32 to vector<8x128xf32>
    %53 = arith.mulf %51, %52 : vector<8x128xf32>
    %54 = arith.index_cast %2 : i32 to index
    %c0_9 = arith.constant 0 : index
    %55 = vector.load %arg3[%54, %c0_9] : memref<8x128xf32, #tpu.memory_space<vmem>>, vector<8x128xf32>
    tpu.vector_store %arg3[%54, %c0_9], %53 {strides = array<i32>} : memref<8x128xf32, #tpu.memory_space<vmem>>, vector<8x128xf32>,
    %c1_i32_10 = arith.constant 1 : i32
    return
  }
  func.func @transform_0(%arg0: i32, %arg1: memref<16xi32, #tpu.memory_space<smem>>) -> (i32, i32) {
    %c0_i32 = arith.constant 0 : i32
    %c0_i32_0 = arith.constant 0 : i32
    %c0_i32_1 = arith.constant 0 : i32
    return %c0_i32, %c0_i32_0 : i32, i32
  }
  func.func @transform_1(%arg0: i32, %arg1: memref<16xi32, #tpu.memory_space<smem>>) -> (i32, i32) {
    %c0_i32 = arith.constant 0 : i32
    %c0_i32_0 = arith.constant 0 : i32
    return %arg0, %c0_i32 : i32, i32
  }
}

</mosaic_0001>

<bundles_post_ra>
// kernel: tpu_custom_call.1
= control target key start
LH: loop header
LB: loop body
LE: loop exit
PB: predicated region body
PF: predicated region fallthrough
CT: control target
= control target key end

     0   :  { %s612_s0 = inlined_call_operand.hbm [shape: s32[16], index: 0, kind: input, shape index: {}]   ;;  %s613_s1 = inlined_call_operand.hbm [shape: f32[64,128], index: 1, kind: input, shape index: {}]   ;;  %s614_s2 = inlined_call_operand.hbm [shape: f32[16,128], index: 2, kind: output, shape index: {}]  }
   0x1   :  { %s330_s11 = scalar_lea.hbm %s612_s0, 16 }
   0x2   :  { %p331_p0 = scmp.ne.s32.totalorder %s612_s0, %s330_s11  ;;  %p334_p1 = scmp.lt.u32.totalorder %s330_s11, %s612_s0 }
   0x4   :  { %p336_p2 = pnand %p334_p1, %p331_p0 }
   0x6   :  { %339 = shalt.err (!%p336_p2)  }
   0x7   :  { %s438_s16 = smov [#allocation3]  }
   0x8   :  { %8 = dma.hbm_to_smem %s612_s0, 16, %s438_s16, [#allocation2] }
   0x9   :  { %412 = dma.done.wait [#allocation2], 16 }
   0xa   :  { %413 = vsyncadd [#allocation2], 4294967280 }
   0xb   :  { %10 = sfence }
   0xc   :  { %11 = vsyncpa [#allocation5], 0 }
   0xd   :  { %12 = vsyncpa [#allocation6], 0 }
   0xe   :  { %14 = vsyncpa [#allocation6 + $0x1], 0  ;;  %s470_s19 = smov 0   ;;  %s472_s20 = smov 0  }
   0xf   :  { %s474_s21 = smov 0   ;;  %s476_s22 = smov 0  }
  0x10 LB: > { %s491_s0 = sadd.s32 4294967295, %s436_s22   ;;  %s266_s23 = sadd.s32 4294967294, %s436_s22   ;;  %s436_s22 = sphi %s476_s22, %s630_s22   ;;  %s432_s21 = sphi %s474_s21, %s629_s21   ;;  %s428_s20 = sphi %s472_s20, %s628_s20   ;;  %s424_s19 = sphi %s470_s19, %s627_s19  }
  0x11   : > { %s495_s24 = sadd.s32 1, %s436_s22   ;;  %s48_s25 = sadd.s32 1, %s432_s21 }
  0x12   : > { %s45_s26 = ssub.s32 %s436_s22, %s495_s24  ;;  %p58_p3 = scmp.ne.s32.totalorder %s432_s21, %s428_s20 }
  0x13   : > { %p46_p4 = scmp.eq.s32.totalorder %s45_s26, 0  ;;  %p59_p5 = scmp.eq.s32.totalorder %s491_s0, 1 }
  0x14   : > { %p64_p6 = scmp.ne.s32.totalorder %s428_s20, %s424_s19  ;;  %p65_p7 = scmp.eq.s32.totalorder %s266_s23, 1 }
  0x15   : > { %s506_s27 = scalar_select %p46_p4, %s432_s21, %s48_s25  }
  0x16   : > { %p508_p8 = por %p59_p5, %p58_p3  ;;  %p512_p9 = por %p65_p7, %p64_p6 }
  0x17   : > { %p267_p10 = scmp.ge.s32.totalorder %s436_s22, 1  ;;  %p72_p11 = scmp.lt.s32.totalorder %s436_s22, 3 }
  0x18   : > { %s618_s28 = scalar_select %p508_p8, 1, 0 }
  0x19   : > { %s619_s29 = scalar_select %p512_p9, 1, 0 }
  0x1a   : > { %p615_p12 = scmp.eq.s32.totalorder %s491_s0, 0  ;;  %p519_p13 = pnand %p267_p10, %p72_p11 }
  0x1b   : > { %s439_s3 = smov [#allocation4]   ;;  %s340_s8 = scalar_lea.hbm %s613_s1, 1024 }
  0x1c   : > { %s620_s30 = scalar_select %p519_p13, 1, 0 }
  0x1d   : > { %s84_s4 = sshll.u32 %s439_s3, 4  ;;  %p283_p0 = pneg %p519_p13  ;;  %s85_s4 = int_to_ptr.vmem [resolvable:$true] %s84_s4 }
  0x1e   : > { %p341_p2 = scmp.ne.s32.totalorder %s613_s1, %s340_s8  ;;  %p347_p6 = scmp.lt.u32.totalorder %s340_s8, %s613_s1 }
  0x1f   : > { %p527_p1 = pnand %p615_p12, %p283_p0 }
  0x21   : > { %p342_p3 = pneg %p527_p1 }
  0x23   : > { %p343_p4 = pnand %p342_p3, %p341_p2 }
  0x25   : > { %p344_p5 = pneg %p343_p4 }
  0x27   : > { %p349_p7 = pnand %p347_p6, %p344_p5 }
  0x29   : > { %352 = shalt.err (!%p349_p7)
}
  0x2a   : > { %s353_s13 = scalar_lea.vmem %s85_s4, 1024  ;;  %p361_p12 = scmp.lt.s32.totalorder %s85_s4, %s85_s4 }
  0x2b   : > { %p354_p10 = scmp.ne.s32.totalorder %s85_s4, %s353_s13  ;;  %p362_p9 = scmp.lt.s32.totalorder %s353_s13, %s353_s13 }
  0x2d   : > { %p356_p11 = pnand %p354_p10, %p342_p3  ;;  %p363_p8 = por %p362_p9, %p361_p12 }
  0x2f   : > { %p357_p0 = pneg %p356_p11 }
  0x31   : > { %p364_p13 = pnand %p363_p8, %p357_p0 }
  0x33   : > { %367 = shalt.err (!%p364_p13)
}
  0x34   : > { %s440_s14 = smov 128   ;;  %s441_s15 = smov 8  }
  0x35   : > { %286 = dma.hbm_to_vmem [thread:$0]  (!%p527_p1), %s613_s1, 1024, %s85_s4, [#allocation5], %s440_s14, %s440_s14, %s441_s15  }
  0x36   : > { %p622_p2 = scmp.ne.s32.totalorder %s620_s30, 0 }
  0x37   : > { %p623_p4 = scmp.eq.s32.totalorder (!%p622_p2), %s491_s0, 0 }
  0x38   : > { %100 = sbr.rel (%p622_p2) target bundleno = 103 (0x67), region = 24 }
  0x3f   : > { %415 = dma.done.wait (%p623_p4), [#allocation5], 1024   ;;  %p624_p3 = pmov %p623_p4 }
  0x40   : > { %s272_s18 = sshll.u32 %s491_s0, 3  ;;  %s112_s25 = sand.u32 1, %s428_s20   ;;  %vm169_vm0 = vcmask 1040384   ;;  %vm171_vm1 = vcmask 1041408   ;;  %vm173_vm2 = vcmask 1042432   ;;  %vm175_vm3 = vcmask 1043456  }
  0x41   : > { %417 = vsyncadd (%p624_p3), [#allocation5], 4294966272  ;;  %s117_s23 = sld [smem:[#allocation3 + %s272_s18]]  ;;  %s120_s26 = sadd.s32 1, %s272_s18  ;;  %vm177_vm4 = vcmask 1044480   ;;  %vm179_vm5 = vcmask 1045504  }
  0x42   : > { %s121_s3 = sld [smem:[#allocation3 + %s120_s26]]  ;;  %s124_s5 = sadd.s32 2, %s272_s18  ;;  %vm181_vm6 = vcmask 1046528  }
  0x43   : > { %s125_s6 = sld [smem:[#allocation3 + %s124_s5]]  ;;  %s128_s7 = sadd.s32 3, %s272_s18 }
  0x44   : > { %s129_s4 = sld [smem:[#allocation3 + %s128_s7]]  ;;  %s132_s8 = sadd.s32 4, %s272_s18 }
  0x45   : > { %s133_s30 = sld [smem:[#allocation3 + %s132_s8]]  ;;  %s136_s9 = sadd.s32 5, %s272_s18 }
  0x46   : > { %s137_s10 = sld [smem:[#allocation3 + %s136_s9]]  ;;  %s140_s11 = sadd.s32 6, %s272_s18 }
  0x47   : > { %s144_s12 = sadd.s32 7, %s272_s18  ;;  %s555_s13 = sld [smem:[#allocation3 + %s140_s11]] }
  0x48   : > { %s118_s14 = scalar_lea.vmem [#allocation4], %s117_s23  ;;  %s122_s15 = scalar_lea.vmem [#allocation4], %s121_s3 }
  0x49   : > { %v119_v0 = vld [vmem:[%s118_s14] sm:$0x1]  ;;  %s145_s16 = sld [smem:[#allocation3 + %s144_s12]]  ;;  %s126_s17 = scalar_lea.vmem [#allocation4], %s125_s6 }
  0x4a   : > { %v123_v1 = vld [vmem:[%s122_s15] sm:$0x1]  ;;  %s559_s26 = sshll.u32 %s112_s25, 3  ;;  %s130_s5 = scalar_lea.vmem [#allocation4], %s129_s4 }
  0x4b   : > { %v127_v2 = vld [vmem:[%s126_s17] sm:$0x1]  ;;  %v149_v3 = vrot.slane %v123_v1, 7  ;;  %s134_s18 = scalar_lea.vmem [#allocation4], %s133_s30  ;;  %s114_s7 = scalar_lea.vmem [#allocation7], %s559_s26 }
  0x4c   : > { %v131_v4 = vld [vmem:[%s130_s5] sm:$0x1]  ;;  %v152_v5 = vrot.slane %v127_v2, 6  ;;  %s138_s23 = scalar_lea.vmem [#allocation4], %s137_s10  ;;  %s199_s4 = sshll.u32 %s114_s7, 4  ;;  %s565_s4 = int_to_ptr.vmem [resolvable:$true] %s199_s4 }
  0x4d   : > { %v135_v6 = vld [vmem:[%s134_s18] sm:$0x1]  ;;  %v155_v7 = vrot.slane %v131_v4, 5  ;;  %v170_v8 = vsel %vm169_vm0, %v119_v0, %v149_v3  ;;  %s142_s3 = scalar_lea.vmem [#allocation4], %s555_s13  ;;  %s274_s8 = sshll.u32 %s491_s0, 7 }
  0x4e   : > { %v139_v9 = vld [vmem:[%s138_s23] sm:$0x1]  ;;  %v158_v10 = vrot.slane %v135_v6, 4  ;;  %v172_v11 = vsel %vm171_vm1, %v170_v8, %v152_v5  ;;  %s570_s10 = scalar_lea.hbm %s614_s2, %s274_s8  ;;  %s186_s11 = scalar_lea.sflag [#allocation6], %s112_s25 }
  0x4f   : > { %v161_v12 = vrot.slane %v139_v9, 3  ;;  %v174_v13 = vsel %vm173_vm2, %v172_v11, %v155_v7  ;;  %v143_v14 = vld [vmem:[%s142_s3] sm:$0x1]  ;;  %s146_s6 = scalar_lea.vmem [#allocation4], %s145_s16  ;;  %s368_s12 = scalar_lea.vmem %s565_s4, 128 }
  0x50   : > { %v176_v15 = vsel %vm175_vm3, %v174_v13, %v158_v10  ;;  %v147_v16 = vld [vmem:[%s146_s6] sm:$0x1]  ;;  %v164_v17 = vrot.slane %v143_v14, 2  ;;  %p369_p8 = scmp.ne.s32.totalorder %s565_s4, %s368_s12  ;;  %p625_p9 = scmp.ne.s32.totalorder %s618_s28, 0 }
  0x51   : > { %v178_v18 = vsel %vm177_vm4, %v176_v15, %v161_v12  ;;  %v167_v19 = vrot.slane %v147_v16, 1  ;;  %s442_s0 = smov [#allocation7]  }
  0x52   : > { %v180_v20 = vsel %vm179_vm5, %v178_v18, %v164_v17  ;;  %p370_p12 = pnand %p369_p8, %p625_p9  ;;  %s372_s13 = sshll.u32 %s442_s0, 4  ;;  %s373_s13 = int_to_ptr.vmem [resolvable:$false] %s372_s13 }
  0x53   : > { %v182_v21 = vsel %vm181_vm6, %v180_v20, %v167_v19  ;;  %s374_s14 = scalar_lea.vmem %s373_s13, 256  ;;  %p375_p1 = scmp.lt.s32.totalorder %s565_s4, %s373_s13 }
  0x54   : > { %v183_v22 = vmul.f32 11.313708, %v182_v21  ;;  %p371_p13 = pneg %p370_p12  ;;  %p376_p5 = scmp.lt.s32.totalorder %s374_s14, %s368_s12 }
  0x56   : > { %184 = vst [vmem:[%s114_s7] sm:$0xff] %v183_v22  ;;  %p377_p6 = por %p376_p5, %p375_p1 }
  0x58   : > { %p378_p7 = pnand %p377_p6, %p371_p13 }
  0x5a   : > { %381 = shalt.err (!%p378_p7)
}
  0x5b   : > { %s382_s25 = scalar_lea.hbm %s570_s10, 128  ;;  %s386_s17 = scalar_lea.hbm %s614_s2, 256 }
  0x5c   : > { %p383_p10 = scmp.ne.s32.totalorder %s570_s10, %s382_s25  ;;  %p387_p2 = scmp.lt.u32.totalorder %s570_s10, %s614_s2 }
  0x5d   : > { %p388_p4 = scmp.lt.u32.totalorder %s386_s17, %s382_s25  ;;  %p390_p8 = scmp.lt.u32.totalorder %s382_s25, %s570_s10 }
  0x5e   : > { %p384_p11 = pnand %p383_p10, %p625_p9 }
  0x5f   : > { %p389_p3 = por %p388_p4, %p387_p2 }
  0x60   : > { %p385_p0 = pneg %p384_p11 }
  0x61   : > { %p391_p12 = por %p390_p8, %p389_p3 }
  0x63   : > { %p392_p13 = pnand %p391_p12, %p385_p0 }
  0x65   : > { %395 = shalt.err (!%p392_p13)
}
  0x66   : > { %281 = dma.vmem_to_hbm [thread:$0]  (%p625_p9), %s565_s4, 128, %s570_s10, %s186_s11  }
  0x67 PF: > { %p293_p1 = scmp.ge.s32.totalorder %s436_s22, 2  ;;  %s211_s18 = sand.u32 1, %s424_s19  }
  0x68   : > { %p626_p5 = scmp.ne.s32.totalorder %s619_s29, 0  ;;  %s212_s23 = scalar_lea.sflag [#allocation6], %s211_s18 }
  0x6a   : > { %p288_p6 = pnand %p293_p1, %p626_p5 }
  0x6c   : > { %419 = dma.done.wait (!%p288_p6), %s212_s23, 128  }
  0x6d   : > { %421 = vsyncadd (!%p288_p6), %s212_s23, 4294967168  ;;  %p17_p7 = scmp.ge.s32.totalorder %s495_s24, 4   ;;  %s627_s19 = smov %s428_s20 }
  0x6e   : > { %s628_s20 = smov %s432_s21  ;;  %s629_s21 = smov %s506_s27 }
  0x6f   : > { %s630_s22 = smov %s495_s24  ;;  %19 = sbr.rel (!%p17_p7) target bundleno = 16 (0x10), region = 69 }
  0x76   :  { %217 = vsyncpa [#allocation5], 1 }
  0x77   :  { %219 = vsyncpa [#allocation5 + $0x1], 1 }
  0x78   :  { %220 = vsyncpa [#allocation6], 1 }
  0x79   :  { %222 = vsyncpa [#allocation6 + $0x1], 1 }

</bundles_post_ra>
